<compile_context>
chip_gen: v5e
topology: v5e:2x2
jax: 0.10.0
libtpu: 0.0.40
codegen_flags: <defaults>
</compile_context>

<pallas_src>
import functools

import jax
import jax.numpy as jnp
from jax.experimental import pallas as pl
from jax.experimental.pallas import tpu as pltpu

_MAX_ROWS = 512   # sublane rows per grid step (multiple of 8; VMEM-safe on v7x)


def _default_lanes():
    """Lane width T of the cumsum operator: match the MXU width."""
    try:
        kind = jax.devices()[0].device_kind.lower()
    except Exception:
        return 128
    # v5e and older: 128-wide MXU -> K=N=128 is native.  v6e/v7x: 256-wide MXU.
    if any(v in kind for v in ("v2", "v3", "v4", "v5")):
        return 128
    return 256


def _lovasz_kernel(err_ref, lab_ref, out_ref,
                   tri_ref, ltri_ref, pos_ref, carry_ref, acc_ref, *, total):
    # err_ref:   (1, R, T) f32  slab of the descending-sorted hinge errors.
    # lab_ref:   (1, R, T) bf16 slab of the co-sorted one-hot labels.
    # out_ref:   (1, 8, 128) f32 — per-sample loss broadcast over a tile.
    # tri_ref:   (T, T) bf16 scratch, upper-triangular ones (cumsum operator).
    # ltri_ref:  (R, R) f32 scratch, strictly-lower ones (row-carry operator).
    # pos_ref:   (R, T) f32 scratch, 1-based positions local to a slab.
    # carry_ref: (1, 1) f32 scratch, # of labels seen so far this sample.
    # acc_ref:   (1, T) f32 scratch, lane-wise per-sample loss accumulator.
    b = pl.program_id(1)
    nb = pl.num_programs(1)
    _, rows, lanes = lab_ref.shape

    @pl.when(b == 0)
    def _init():
        # Regenerated at the start of every sample -> megacore-safe when the
        # sample axis is "parallel"; amortized over all P-blocks of the sample.
        ri = jax.lax.broadcasted_iota(jnp.int32, (lanes, lanes), 0)
        ci = jax.lax.broadcasted_iota(jnp.int32, (lanes, lanes), 1)
        tri_ref[...] = jnp.where(ri <= ci, 1.0, 0.0).astype(jnp.bfloat16)
        rr = jax.lax.broadcasted_iota(jnp.int32, (rows, rows), 0)
        cc = jax.lax.broadcasted_iota(jnp.int32, (rows, rows), 1)
        ltri_ref[...] = jnp.where(cc < rr, 1.0, 0.0).astype(jnp.float32)
        pr = jax.lax.broadcasted_iota(jnp.int32, (rows, lanes), 0)
        pc = jax.lax.broadcasted_iota(jnp.int32, (rows, lanes), 1)
        pos_ref[...] = (pr * lanes + pc + 1).astype(jnp.float32)
        carry_ref[...] = jnp.zeros_like(carry_ref)
        acc_ref[...] = jnp.zeros_like(acc_ref)

    errors = err_ref[0]                                       # (R, T) f32
    labels_lp = lab_ref[0]                                    # (R, T) bf16
    labels = labels_lp.astype(jnp.float32)                    # exact 0/1

    # 1) within-row inclusive cumsum on the MXU (bf16 operands, f32 accumulate).
    cs_row = jnp.dot(labels_lp, tri_ref[...],
                     preferred_element_type=jnp.float32)      # (R, T)

    # 2) carry across the R rows of this slab: exclusive prefix of row sums,
    #    computed as a narrow (R, R) x (R, 1) matmul (row sums are free: they
    #    are the last column of the inclusive row cumsum).
    row_tot = cs_row[:, lanes - 1:lanes]                      # (R, 1)
    row_carry = jnp.dot(ltri_ref[...], row_tot,
                        preferred_element_type=jnp.float32)   # (R, 1)

    # 3) carry across slabs processed earlier for this sample.
    carry_in = carry_ref[...]                                 # (1, 1)
    cs = cs_row + row_carry + carry_in                        # cumsum(labels)

    # cumsum(1 - labels) = position - cumsum(labels); positions are 1-based.
    # TODO(synk): positions are tracked in f32 — exact only up to P ~ 2^24
    # elements per sample; beyond that the IoU denominators pick up O(1) ulps.
    base = (b * (rows * lanes)).astype(jnp.float32)
    pos = pos_ref[...] + base
    cs_neg = pos - cs

    # 4) Lovasz gradient  grad_i = iou_i - iou_{i-1}  over a common denominator:
    #    iou_i = 1 - (total - cs_i) / (total + cs_neg_i)
    #    cs_{i-1} = cs_i - labels_i ; cs_neg_{i-1} = cs_neg_i - (1 - labels_i)
    #    => grad_i = [labels_i*(total+cs_neg_i) + (1-labels_i)*(total-cs_i)]
    #                / [(total + cs_neg_i - (1-labels_i)) * (total + cs_neg_i)]
    #    (at global index 0 this reduces to iou_0, matching the reference).
    union = total + cs_neg
    num = labels * union + (1.0 - labels) * (total - cs)
    denom = (union - (1.0 - labels)) * union
    inv = pl.reciprocal(denom, approx=True)                   # EUP slot
    inv = inv * (2.0 - denom * inv)                           # one Newton step
    grad = num * inv

    # Sublane-only reduce per step; the 128->1 lane reduce waits for finalize.
    contrib = jnp.maximum(errors, 0.0) * grad                 # (R, T)
    acc_ref[...] = acc_ref[...] + jnp.sum(contrib, axis=0, keepdims=True)
    # Running label count = last element of the cumsum we already computed.
    carry_ref[...] = cs[rows - 1:rows, lanes - 1:lanes]

    @pl.when(b == nb - 1)
    def _finalize():
        loss = jnp.sum(acc_ref[...], axis=1, keepdims=True)   # (1, 1)
        out_ref[...] = jnp.broadcast_to(loss, (1, 8, 128))


@jax.jit
def lovasz_loss_2d(inputs, targets):
    """Forward pass of LovaszLoss2d. inputs: (N,C,H,W) f32, targets: (N,H,W) int."""
    N, C, H, W = inputs.shape
    P = C * H * W
    T = _default_lanes()

    inputs_flat = inputs.reshape(N, P).astype(jnp.float32)
    # One-hot labels via comparison (same values as torch scatter_, no scatter).
    classes = jnp.arange(C, dtype=targets.dtype).reshape(1, C, 1, 1)
    onehot = targets[:, None, :, :] == classes
    labels_f32 = onehot.astype(jnp.float32).reshape(N, P)
    # bf16 labels are exact for 0/1: halves the label DMA stream and runs the
    # cumsum matmul at native bf16 MXU rate.
    labels_bf16 = onehot.astype(jnp.bfloat16).reshape(N, P)

    margins = 1.0 - (labels_f32 * 2.0 - 1.0) * inputs_flat
    # TODO(synk): the descending sort has no Pallas TPU primitive; it stays in
    # XLA. One lax.sort carries the labels along instead of argsort + gathers.
    neg_sorted, labels_sorted = jax.lax.sort(
        (-margins, labels_bf16), dimension=-1, num_keys=1)
    errors_sorted = -neg_sorted

    # ---- tile the sorted sequence into sublane/lane-dense (R, T) slabs ------
    nr = -(-P // T)
    R = min(_MAX_ROWS, max(8, nr))
    R -= R % 8                        # multiple of 8 sublanes, >= 8
    nr = -(-nr // R) * R              # row count padded to a multiple of R
    P_pad = nr * T
    if P_pad != P:
        pad = P_pad - P
        # padded errors <= 0 (killed by relu) and padded labels == 0.
        errors_sorted = jnp.pad(errors_sorted, ((0, 0), (0, pad)),
                                constant_values=-1.0)
        labels_sorted = jnp.pad(labels_sorted, ((0, 0), (0, pad)),
                                constant_values=0.0)
    errors_sorted = errors_sorted.reshape(N, nr, T)
    labels_sorted = labels_sorted.reshape(N, nr, T)
    nb = nr // R

    # Sum of one-hot labels per sample is exactly H*W (static).
    # TODO(synk): if targets may hold an ignore / out-of-range index, this
    # static total diverges from labels.sum() and must be computed per sample.
    total = float(H * W)

    out = pl.pallas_call(
        functools.partial(_lovasz_kernel, total=total),
        out_shape=jax.ShapeDtypeStruct((N, 8, 128), jnp.float32),
        grid_spec=pltpu.PrefetchScalarGridSpec(
            num_scalar_prefetch=0,
            grid=(N, nb),
            in_specs=[
                pl.BlockSpec((1, R, T), lambda n, b: (n, b, 0)),
                pl.BlockSpec((1, R, T), lambda n, b: (n, b, 0)),
            ],
            out_specs=pl.BlockSpec((1, 8, 128), lambda n, b: (n, 0, 0)),
            scratch_shapes=[
                pltpu.VMEM((T, T), jnp.bfloat16),   # upper-tri cumsum operator
                pltpu.VMEM((R, R), jnp.float32),    # strictly-lower row carry
                pltpu.VMEM((R, T), jnp.float32),    # 1-based local positions
                pltpu.VMEM((1, 1), jnp.float32),    # running label count
                pltpu.VMEM((1, T), jnp.float32),    # lane-wise loss accumulator
            ],
        ),
        compiler_params=pltpu.CompilerParams(
            # Sample axis parallel -> both v7x TensorCores busy for N >= 2.
            dimension_semantics=("parallel", "arbitrary"),
        ),
    )(errors_sorted, labels_sorted)

    per_sample = out[:, 0, 0]   # per-sample losses available for free
    return jnp.sum(per_sample) / N


def _lovasz_ref(inputs, targets):
    """Pure-JAX port of the PyTorch forward (verification only)."""
    N, C, H, W = inputs.shape
    masks = jax.nn.one_hot(targets, C, axis=1, dtype=inputs.dtype)
    loss = 0.0
    for n in range(N):
        mask = masks[n].reshape(-1)
        inp = inputs[n].reshape(-1)
        errors = 1.0 - (mask * 2.0 - 1.0) * inp
        order = jnp.argsort(-errors)
        errors_sorted = errors[order]
        labels_sorted = mask[order]
        inter = labels_sorted.sum() - jnp.cumsum(labels_sorted)
        union = labels_sorted.sum() + jnp.cumsum(1.0 - labels_sorted)
        iou = 1.0 - inter / union
        iou = iou.at[1:].set(iou[1:] - iou[:-1])
        loss = loss + jnp.dot(jax.nn.relu(errors_sorted), iou)
    return loss / N


if __name__ == "__main__":
    key = jax.random.PRNGKey(0)
    k1, k2 = jax.random.split(key)
    N, C, H, W = 2, 4, 16, 16
    inputs = jax.random.normal(k1, (N, C, H, W), dtype=jnp.float32)
    targets = jax.random.randint(k2, (N, H, W), 0, C, dtype=jnp.int32)

    loss = jax.block_until_ready(lovasz_loss_2d(inputs, targets))
    ref = jax.block_until_ready(_lovasz_ref(inputs, targets))

    assert bool(jnp.isfinite(loss)), "non-finite loss"
    assert bool(jnp.allclose(loss, ref, rtol=1e-4, atol=1e-4)), (loss, ref)
    print("KERNEL_OK")
</pallas_src>

<mosaic_0001>
module attributes {stable_mosaic.version = 11 : i64} {
  func.func @_lovasz_kernel(%arg0: i32, %arg1: i32, %arg2: memref<1x8x256xf32, #tpu.memory_space<vmem>>, %arg3: memref<1x8x256xbf16, #tpu.memory_space<vmem>>, %arg4: memref<1x8x128xf32, #tpu.memory_space<vmem>>, %arg5: memref<256x256xbf16, #tpu.memory_space<vmem>>, %arg6: memref<8x8xf32, #tpu.memory_space<vmem>>, %arg7: memref<8x256xf32, #tpu.memory_space<vmem>>, %arg8: memref<1x1xf32, #tpu.memory_space<vmem>>, %arg9: memref<1x256xf32, #tpu.memory_space<vmem>>) attributes {dimension_semantics = [#tpu.dimension_semantics<parallel>, #tpu.dimension_semantics<arbitrary>], iteration_bounds = array<i64: 2, 1>, scalar_prefetch = 0 : i64, scratch_operands = 5 : i64, tpu.core_type = #tpu.core_type<tc>, window_params = [{transform_indices = @transform_0, window_bounds = array<i64: 1, 8, 256>}, {transform_indices = @transform_1, window_bounds = array<i64: 1, 8, 256>}, {transform_indices = @transform_2, window_bounds = array<i64: 1, 8, 128>}]} {
    %c0_i32 = arith.constant 0 : i32
    %0 = arith.cmpi eq, %arg1, %c0_i32 : i32
    %1 = arith.extui %0 : i1 to i32
    %c0_i32_0 = arith.constant 0 : i32
    %2 = arith.cmpi ne, %1, %c0_i32_0 : i32
    scf.if %2 {
      %56 = tpu.iota {dimensions = array<i32: 0>} : vector<256x256xi32>
      %57 = tpu.iota {dimensions = array<i32: 1>} : vector<256x256xi32>
      %58 = arith.cmpi sle, %56, %57 : vector<256x256xi32>
      %cst_30 = arith.constant 1.000000e+00 : f32
      %cst_31 = arith.constant 0.000000e+00 : f32
      %59 = vector.broadcast %cst_30 : f32 to vector<256x256xf32>
      %60 = vector.broadcast %cst_31 : f32 to vector<256x256xf32>
      %61 = arith.select %58, %59, %60 : vector<256x256xi1>, vector<256x256xf32>
      %62 = arith.truncf %61 : vector<256x256xf32> to vector<256x256xbf16>
      %c0_32 = arith.constant 0 : index
      %c0_33 = arith.constant 0 : index
      %63 = vector.load %arg5[%c0_32, %c0_33] : memref<256x256xbf16, #tpu.memory_space<vmem>>, vector<256x256xbf16>
      tpu.vector_store %arg5[%c0_32, %c0_33], %62 {strides = array<i32>} : memref<256x256xbf16, #tpu.memory_space<vmem>>, vector<256x256xbf16>,
      %64 = tpu.iota {dimensions = array<i32: 0>} : vector<8x8xi32>
      %65 = tpu.iota {dimensions = array<i32: 1>} : vector<8x8xi32>
      %66 = arith.cmpi slt, %65, %64 : vector<8x8xi32>
      %cst_34 = arith.constant 1.000000e+00 : f32
      %cst_35 = arith.constant 0.000000e+00 : f32
      %67 = vector.broadcast %cst_34 : f32 to vector<8x8xf32>
      %68 = vector.broadcast %cst_35 : f32 to vector<8x8xf32>
      %69 = arith.select %66, %67, %68 : vector<8x8xi1>, vector<8x8xf32>
      %c0_36 = arith.constant 0 : index
      %c0_37 = arith.constant 0 : index
      %70 = vector.load %arg6[%c0_36, %c0_37] : memref<8x8xf32, #tpu.memory_space<vmem>>, vector<8x8xf32>
      tpu.vector_store %arg6[%c0_36, %c0_37], %69 {strides = array<i32>} : memref<8x8xf32, #tpu.memory_space<vmem>>, vector<8x8xf32>,
      %71 = tpu.iota {dimensions = array<i32: 0>} : vector<8x256xi32>
      %72 = tpu.iota {dimensions = array<i32: 1>} : vector<8x256xi32>
      %c256_i32 = arith.constant 256 : i32
      %73 = vector.broadcast %c256_i32 : i32 to vector<8x256xi32>
      %74 = arith.muli %71, %73 : vector<8x256xi32>
      %75 = arith.addi %74, %72 : vector<8x256xi32>
      %c1_i32 = arith.constant 1 : i32
      %76 = vector.broadcast %c1_i32 : i32 to vector<8x256xi32>
      %77 = arith.addi %75, %76 : vector<8x256xi32>
      %78 = arith.sitofp %77 : vector<8x256xi32> to vector<8x256xf32>
      %c0_38 = arith.constant 0 : index
      %c0_39 = arith.constant 0 : index
      %79 = vector.load %arg7[%c0_38, %c0_39] : memref<8x256xf32, #tpu.memory_space<vmem>>, vector<8x256xf32>
      tpu.vector_store %arg7[%c0_38, %c0_39], %78 {strides = array<i32>} : memref<8x256xf32, #tpu.memory_space<vmem>>, vector<8x256xf32>,
      %cst_40 = arith.constant 0.000000e+00 : f32
      %80 = vector.broadcast %cst_40 : f32 to vector<1x1xf32>
      %c0_41 = arith.constant 0 : index
      %c0_42 = arith.constant 0 : index
      %81 = vector.load %arg8[%c0_41, %c0_42] : memref<1x1xf32, #tpu.memory_space<vmem>>, vector<1x1xf32>
      tpu.vector_store %arg8[%c0_41, %c0_42], %80 {strides = array<i32>} : memref<1x1xf32, #tpu.memory_space<vmem>>, vector<1x1xf32>,
      %cst_43 = arith.constant 0.000000e+00 : f32
      %82 = vector.broadcast %cst_43 : f32 to vector<1x256xf32>
      %c0_44 = arith.constant 0 : index
      %c0_45 = arith.constant 0 : index
      %83 = vector.load %arg9[%c0_44, %c0_45] : memref<1x256xf32, #tpu.memory_space<vmem>>, vector<1x256xf32>
      tpu.vector_store %arg9[%c0_44, %c0_45], %82 {strides = array<i32>} : memref<1x256xf32, #tpu.memory_space<vmem>>, vector<1x256xf32>,
    } else {
    }
    %c0 = arith.constant 0 : index
    %c0_1 = arith.constant 0 : index
    %c0_2 = arith.constant 0 : index
    %3 = vector.load %arg2[%c0, %c0_1, %c0_2] : memref<1x8x256xf32, #tpu.memory_space<vmem>>, vector<1x8x256xf32>
    %4 = vector.shape_cast %3 : vector<1x8x256xf32> to vector<8x256xf32>
    %c0_3 = arith.constant 0 : index
    %c0_4 = arith.constant 0 : index
    %c0_5 = arith.constant 0 : index
    %5 = vector.load %arg3[%c0_3, %c0_4, %c0_5] : memref<1x8x256xbf16, #tpu.memory_space<vmem>>, vector<1x8x256xbf16>
    %6 = vector.shape_cast %5 : vector<1x8x256xbf16> to vector<8x256xbf16>
    %7 = arith.extf %6 : vector<8x256xbf16> to vector<8x256xf32>
    %c0_6 = arith.constant 0 : index
    %c0_7 = arith.constant 0 : index
    %8 = vector.load %arg5[%c0_6, %c0_7] : memref<256x256xbf16, #tpu.memory_space<vmem>>, vector<256x256xbf16>
    %cst = arith.constant dense<0.000000e+00> : vector<8x256xf32>
    %9 = tpu.matmul %6, %8, %cst {dimension_numbers = #tpu.dot_dimension_numbers<[1], [0], [0], [1], [0, 0, 1, 1], [], []>} : vector<8x256xbf16>, vector<256x256xbf16>, vector<8x256xf32> -> vector<8x256xf32>
    %10 = vector.extract_strided_slice %9 {offsets = [0, 255], sizes = [8, 1], strides = [1, 1]} : vector<8x256xf32> to vector<8x1xf32>
    %c0_8 = arith.constant 0 : index
    %c0_9 = arith.constant 0 : index
    %11 = vector.load %arg6[%c0_8, %c0_9] : memref<8x8xf32, #tpu.memory_space<vmem>>, vector<8x8xf32>
    %cst_10 = arith.constant dense<0.000000e+00> : vector<8x1xf32>
    %12 = tpu.matmul %11, %10, %cst_10 {dimension_numbers = #tpu.dot_dimension_numbers<[1], [0], [0], [1], [0, 0, 1, 1], [], []>} : vector<8x8xf32>, vector<8x1xf32>, vector<8x1xf32> -> vector<8x1xf32>
    %c0_11 = arith.constant 0 : index
    %c0_12 = arith.constant 0 : index
    %13 = vector.load %arg8[%c0_11, %c0_12] : memref<1x1xf32, #tpu.memory_space<vmem>>, vector<1x1xf32>
    %14 = vector.broadcast %12 : vector<8x1xf32> to vector<8x256xf32>
    %15 = arith.addf %9, %14 : vector<8x256xf32>
    %16 = vector.broadcast %13 : vector<1x1xf32> to vector<8x256xf32>
    %17 = arith.addf %15, %16 : vector<8x256xf32>
    %c2048_i32 = arith.constant 2048 : i32
    %18 = arith.muli %arg1, %c2048_i32 : i32
    %19 = arith.sitofp %18 : i32 to f32
    %c0_13 = arith.constant 0 : index
    %c0_14 = arith.constant 0 : index
    %20 = vector.load %arg7[%c0_13, %c0_14] : memref<8x256xf32, #tpu.memory_space<vmem>>, vector<8x256xf32>
    %21 = vector.broadcast %19 : f32 to vector<8x256xf32>
    %22 = arith.addf %20, %21 : vector<8x256xf32>
    %23 = arith.subf %22, %17 : vector<8x256xf32>
    %cst_15 = arith.constant 2.560000e+02 : f32
    %24 = vector.broadcast %cst_15 : f32 to vector<8x256xf32>
    %25 = arith.addf %24, %23 : vector<8x256xf32>
    %26 = arith.mulf %7, %25 : vector<8x256xf32>
    %cst_16 = arith.constant 1.000000e+00 : f32
    %27 = vector.broadcast %cst_16 : f32 to vector<8x256xf32>
    %28 = arith.subf %27, %7 : vector<8x256xf32>
    %cst_17 = arith.constant 2.560000e+02 : f32
    %29 = vector.broadcast %cst_17 : f32 to vector<8x256xf32>
    %30 = arith.subf %29, %17 : vector<8x256xf32>
    %31 = arith.mulf %28, %30 : vector<8x256xf32>
    %32 = arith.addf %26, %31 : vector<8x256xf32>
    %cst_18 = arith.constant 1.000000e+00 : f32
    %33 = vector.broadcast %cst_18 : f32 to vector<8x256xf32>
    %34 = arith.subf %33, %7 : vector<8x256xf32>
    %35 = arith.subf %25, %34 : vector<8x256xf32>
    %36 = arith.mulf %35, %25 : vector<8x256xf32>
    %37 = tpu.reciprocal %36 {approx = true} : vector<8x256xf32> -> vector<8x256xf32>
    %38 = arith.mulf %36, %37 : vector<8x256xf32>
    %cst_19 = arith.constant 2.000000e+00 : f32
    %39 = vector.broadcast %cst_19 : f32 to vector<8x256xf32>
    %40 = arith.subf %39, %38 : vector<8x256xf32>
    %41 = arith.mulf %37, %40 : vector<8x256xf32>
    %42 = arith.mulf %32, %41 : vector<8x256xf32>
    %cst_20 = arith.constant 0.000000e+00 : f32
    %43 = vector.broadcast %cst_20 : f32 to vector<8x256xf32>
    %44 = arith.maximumf %4, %43 : vector<8x256xf32>
    %45 = arith.mulf %44, %42 : vector<8x256xf32>
    %c0_21 = arith.constant 0 : index
    %c0_22 = arith.constant 0 : index
    %46 = vector.load %arg9[%c0_21, %c0_22] : memref<1x256xf32, #tpu.memory_space<vmem>>, vector<1x256xf32>
    %cst_23 = arith.constant dense<0.000000e+00> : vector<256xf32>
    %47 = vector.multi_reduction <add>, %45, %cst_23 [0] : vector<8x256xf32> to vector<256xf32>
    %48 = vector.shape_cast %47 : vector<256xf32> to vector<1x256xf32>
    %49 = arith.addf %46, %48 : vector<1x256xf32>
    %c0_24 = arith.constant 0 : index
    %c0_25 = arith.constant 0 : index
    %50 = vector.load %arg9[%c0_24, %c0_25] : memref<1x256xf32, #tpu.memory_space<vmem>>, vector<1x256xf32>
    tpu.vector_store %arg9[%c0_24, %c0_25], %49 {strides = array<i32>} : memref<1x256xf32, #tpu.memory_space<vmem>>, vector<1x256xf32>,
    %51 = vector.extract_strided_slice %17 {offsets = [7, 255], sizes = [1, 1], strides = [1, 1]} : vector<8x256xf32> to vector<1x1xf32>
    %c0_26 = arith.constant 0 : index
    %c0_27 = arith.constant 0 : index
    %52 = vector.load %arg8[%c0_26, %c0_27] : memref<1x1xf32, #tpu.memory_space<vmem>>, vector<1x1xf32>
    tpu.vector_store %arg8[%c0_26, %c0_27], %51 {strides = array<i32>} : memref<1x1xf32, #tpu.memory_space<vmem>>, vector<1x1xf32>,
    %c0_i32_28 = arith.constant 0 : i32
    %53 = arith.cmpi eq, %arg1, %c0_i32_28 : i32
    %54 = arith.extui %53 : i1 to i32
    %c0_i32_29 = arith.constant 0 : i32
    %55 = arith.cmpi ne, %54, %c0_i32_29 : i32
    scf.if %55 {
      %c0_30 = arith.constant 0 : index
      %c0_31 = arith.constant 0 : index
      %56 = vector.load %arg9[%c0_30, %c0_31] : memref<1x256xf32, #tpu.memory_space<vmem>>, vector<1x256xf32>
      %cst_32 = arith.constant dense<0.000000e+00> : vector<1xf32>
      %57 = vector.multi_reduction <add>, %56, %cst_32 [1] : vector<1x256xf32> to vector<1xf32>
      %58 = vector.shape_cast %57 : vector<1xf32> to vector<1x1xf32>
      %59 = vector.shape_cast %58 : vector<1x1xf32> to vector<1x1x1xf32>
      %60 = vector.broadcast %59 : vector<1x1x1xf32> to vector<1x8x128xf32>
      %c0_33 = arith.constant 0 : index
      %c0_34 = arith.constant 0 : index
      %c0_35 = arith.constant 0 : index
      %61 = vector.load %arg4[%c0_33, %c0_34, %c0_35] : memref<1x8x128xf32, #tpu.memory_space<vmem>>, vector<1x8x128xf32>
      tpu.vector_store %arg4[%c0_33, %c0_34, %c0_35], %60 {strides = array<i32>} : memref<1x8x128xf32, #tpu.memory_space<vmem>>, vector<1x8x128xf32>,
    } else {
    }
    return
  }
  func.func @transform_0(%arg0: i32, %arg1: i32) -> (i32, i32, i32) {
    %c0_i32 = arith.constant 0 : i32
    %c0_i32_0 = arith.constant 0 : i32
    return %arg0, %arg1, %c0_i32 : i32, i32, i32
  }
  func.func @transform_1(%arg0: i32, %arg1: i32) -> (i32, i32, i32) {
    %c0_i32 = arith.constant 0 : i32
    %c0_i32_0 = arith.constant 0 : i32
    return %arg0, %arg1, %c0_i32 : i32, i32, i32
  }
  func.func @transform_2(%arg0: i32, %arg1: i32) -> (i32, i32, i32) {
    %c0_i32 = arith.constant 0 : i32
    %c0_i32_0 = arith.constant 0 : i32
    %c0_i32_1 = arith.constant 0 : i32
    return %arg0, %c0_i32, %c0_i32_0 : i32, i32, i32
  }
}

</mosaic_0001>

<bundles_post_ra>
// kernel: neg.3
= control target key start
LH: loop header
LB: loop body
LE: loop exit
PB: predicated region body
PF: predicated region fallthrough
CT: control target
= control target key end

     0   :  { %s136_s0 = inlined_call_operand.vmem [shape: f32[2,1024], index: 0, kind: input, shape index: {}]   ;;  %s137_s1 = inlined_call_operand.vmem [shape: f32[2,1024], index: 1, kind: output, shape index: {}]  }
   0x1   :  { %v2_v0 = vld [vmem:[%s136_s0] sm:$0x3]  ;;  %v64_v1 = vld [vmem:[%s136_s0 + $0x2] sm:$0x3]  ;;  %v66_v2 = vld [vmem:[%s136_s0 + $0x4] sm:$0x3] }
   0x2   :  { %v5_v3 = vxor.u32 2147483648, %v2_v0  ;;  %v12_v4 = vxor.u32 2147483648, %v64_v1  ;;  %v20_v5 = vxor.u32 2147483648, %v66_v2  ;;  %v68_v6 = vld [vmem:[%s136_s0 + $0x6] sm:$0x3] }
   0x3   :  { %v28_v7 = vxor.u32 2147483648, %v68_v6  ;;  %v70_v8 = vld [vmem:[%s136_s0 + $0x8] sm:$0x3]  ;;  %v72_v9 = vld [vmem:[%s136_s0 + $0xa] sm:$0x3] }
   0x4   :  { %7 = vst [vmem:[%s137_s1] sm:$0x3] %v5_v3  ;;  %v36_v10 = vxor.u32 2147483648, %v70_v8  ;;  %v74_v11 = vld [vmem:[%s136_s0 + $0xc] sm:$0x3]  ;;  %v44_v12 = vxor.u32 2147483648, %v72_v9 }
   0x5   :  { %65 = vst [vmem:[%s137_s1 + $0x2] sm:$0x3] %v12_v4  ;;  %v76_v13 = vld [vmem:[%s136_s0 + $0xe] sm:$0x3]  ;;  %v52_v14 = vxor.u32 2147483648, %v74_v11 }
   0x6   :  { %67 = vst [vmem:[%s137_s1 + $0x4] sm:$0x3] %v20_v5  ;;  %v60_v15 = vxor.u32 2147483648, %v76_v13 }
   0x7   :  { %69 = vst [vmem:[%s137_s1 + $0x6] sm:$0x3] %v28_v7 }
   0x8   :  { %71 = vst [vmem:[%s137_s1 + $0x8] sm:$0x3] %v36_v10 }
   0x9   :  { %73 = vst [vmem:[%s137_s1 + $0xa] sm:$0x3] %v44_v12 }
   0xa   :  { %75 = vst [vmem:[%s137_s1 + $0xc] sm:$0x3] %v52_v14 }
   0xb   :  { %77 = vst [vmem:[%s137_s1 + $0xe] sm:$0x3] %v60_v15 }

// kernel: lovasz_loss_2d.1
= control target key start
LH: loop header
LB: loop body
LE: loop exit
PB: predicated region body
PF: predicated region fallthrough
CT: control target
= control target key end

     0   :  { %s1183_s9 = smov 0   ;;  %s1185_s10 = smov 0   ;;  %s1390_s0 = inlined_call_operand.vmem [shape: f32[2,8,256], index: 0, kind: input, shape index: {}]   ;;  %s1391_s1 = inlined_call_operand.vmem [shape: bf16[2,8,256], index: 1, kind: input, shape index: {}]   ;;  %s1392_s2 = inlined_call_operand.vmem [shape: f32[2,8,128], index: 2, kind: output, shape index: {}]  }
   0x1   :  { %s1187_s11 = smov 0  }
   0x2 LB: > { %s24_s12 = sadd.s32 1, %s1159_s10  ;;  %p936_p0 = scmp.ge.s32.totalorder %s1163_s11, 1  ;;  %s1163_s11 = sphi %s1187_s11, %s12_s11   ;;  %s1159_s10 = sphi %s1185_s10, %s1396_s10   ;;  %s1155_s9 = sphi %s1183_s9, %s1395_s9  }
   0x3   : > { %p26_p1 = scmp.ge.s32.totalorder %s24_s12, 2  ;;  %p146_p2 = scmp.lt.s32.totalorder %s1163_s11, 3 }
   0x5   : > { %s1398_s12 = smov (%p26_p1, %s24_s12), 0  ;;  %p147_p3 = pnand %p936_p0, %p146_p2 }
   0x6   : > { %p180_p4 = scmp.lt.s32.totalorder (!%p147_p3), %s1155_s9, 1  ;;  %s1166_s17 = smov (!%p147_p3), 1  }
   0x7   : > { %150 = sbr.rel (%p147_p3) target bundleno = 737 (0x2e1), region = 28 }
   0xc   : > { %v206_v0 = vlaneseq  ;;  %v1165_v13 = vmov 0.0   ;;  %s1400_s9 = smov (!%p180_p4, %s1155_s9), 1 }
   0xd   : > { %s1074_s13 = sshll.u32 %s1400_s9, 3  ;;  %s1073_s18 = sshll.u32 %s1400_s9, 4 }
   0xe   : > { %v1204_v1 = vshrl.u32 %v206_v0, 7  ;;  %v1207_v2 = vand.u32 127, %v206_v0  ;;  %s197_s16 = scalar_lea.vmem %s1391_s1, %s1074_s13  ;;  %s188_s21 = scalar_lea.vmem %s1390_s0, %s1073_s18 }
   0xf   : > { %s201_s24 = scalar_lea.vmem %s1392_s2, %s1074_s13 }
  0x10   : > { %v221_v3 = vadd.s32 112, %v1204_v1  ;;  %v222_v4 = vadd.s32 120, %v1204_v1  ;;  %v237_v5 = vadd.s32 240, %v1204_v1  ;;  %v238_v6 = vadd.s32 248, %v1204_v1 }
  0x11   : > { %v1214_v7 = vadd.s32 128, %v1207_v2  ;;  %v219_v8 = vadd.s32 96, %v1204_v1  ;;  %v220_v9 = vadd.s32 104, %v1204_v1  ;;  %v235_v10 = vadd.s32 224, %v1204_v1 }
  0x12   : > { %vm270_vm0 = vcmp.le.s32.totalorder %v221_v3, %v1207_v2  ;;  %vm272_vm1 = vcmp.le.s32.totalorder %v222_v4, %v1207_v2  ;;  %v236_v11 = vadd.s32 232, %v1204_v1  ;;  %v217_v12 = vadd.s32 80, %v1204_v1 }
  0x13   : > { %v334_v14 = vsel %vm270_vm0, 1.0, %v1165_v13  ;;  %v336_v15 = vsel %vm272_vm1, 1.0, %v1165_v13  ;;  %vm303_vm2 = vcmp.le.s32.totalorder %v237_v5, %v1214_v7  ;;  %vm305_vm3 = vcmp.le.s32.totalorder %v238_v6, %v1214_v7 }
  0x14   : > { %v384_v16 = vpack.c.bf16 1.0, %v334_v14  ;;  %v385_v17 = vpack.c.bf16 1.0, %v336_v15  ;;  %v367_v18 = vsel %vm303_vm2, 1.0, %v1165_v13  ;;  %v369_v19 = vsel %vm305_vm3, 1.0, %v1165_v13 }
  0x15   : > { %v400_v20 = vpack.c.bf16 %v367_v18, %v1165_v13  ;;  %v401_v21 = vpack.c.bf16 %v369_v19, %v1165_v13  ;;  %vm266_vm4 = vcmp.le.s32.totalorder %v219_v8, %v1207_v2  ;;  %vm268_vm5 = vcmp.le.s32.totalorder %v220_v9, %v1207_v2 }
  0x16   : > { %416 = vst [vmem:[#allocation2 + $0x70] sm:$0xff] %v384_v16  ;;  %v330_v22 = vsel %vm266_vm4, 1.0, %v1165_v13  ;;  %v332_v23 = vsel %vm268_vm5, 1.0, %v1165_v13  ;;  %vm299_vm6 = vcmp.le.s32.totalorder %v235_v10, %v1214_v7  ;;  %vm301_vm7 = vcmp.le.s32.totalorder %v236_v11, %v1214_v7 }
  0x17   : > { %417 = vst [vmem:[#allocation2 + $0x78] sm:$0xff] %v385_v17  ;;  %v382_v24 = vpack.c.bf16 1.0, %v330_v22  ;;  %v383_v25 = vpack.c.bf16 1.0, %v332_v23  ;;  %v363_v26 = vsel %vm299_vm6, 1.0, %v1165_v13  ;;  %v365_v27 = vsel %vm301_vm7, 1.0, %v1165_v13 }
  0x18   : > { %432 = vst [vmem:[#allocation2 + $0xf0] sm:$0xff] %v400_v20  ;;  %v398_v28 = vpack.c.bf16 %v363_v26, %v1165_v13  ;;  %v399_v29 = vpack.c.bf16 %v365_v27, %v1165_v13  ;;  %v218_v30 = vadd.s32 88, %v1204_v1  ;;  %vm262_vm8 = vcmp.le.s32.totalorder %v217_v12, %v1207_v2 }
  0x19   : > { %433 = vst [vmem:[#allocation2 + $0xf8] sm:$0xff] %v401_v21  ;;  %v326_v31 = vsel %vm262_vm8, 1.0, %v1165_v13  ;;  %v233_v32 = vadd.s32 208, %v1204_v1  ;;  %v234_v33 = vadd.s32 216, %v1204_v1  ;;  %v215_v34 = vadd.s32 64, %v1204_v1 }
  0x1a   : > { %414 = vst [vmem:[#allocation2 + $0x60] sm:$0xff] %v382_v24  ;;  %vm264_vm9 = vcmp.le.s32.totalorder %v218_v30, %v1207_v2  ;;  %v380_v35 = vpack.c.bf16 1.0, %v326_v31  ;;  %v216_v36 = vadd.s32 72, %v1204_v1  ;;  %v231_v37 = vadd.s32 192, %v1204_v1 }
  0x1b   : > { %415 = vst [vmem:[#allocation2 + $0x68] sm:$0xff] %v383_v25  ;;  %v328_v38 = vsel %vm264_vm9, 1.0, %v1165_v13  ;;  %vm295_vm10 = vcmp.le.s32.totalorder %v233_v32, %v1214_v7  ;;  %vm297_vm11 = vcmp.le.s32.totalorder %v234_v33, %v1214_v7  ;;  %vm258_vm12 = vcmp.le.s32.totalorder %v215_v34, %v1207_v2 }
  0x1c   : > { %430 = vst [vmem:[#allocation2 + $0xe0] sm:$0xff] %v398_v28  ;;  %v381_v39 = vpack.c.bf16 1.0, %v328_v38  ;;  %v359_v40 = vsel %vm295_vm10, 1.0, %v1165_v13  ;;  %v361_v41 = vsel %vm297_vm11, 1.0, %v1165_v13  ;;  %vm260_vm13 = vcmp.le.s32.totalorder %v216_v36, %v1207_v2 }
  0x1d   : > { %v1089_v42 = vld [vmem:[#allocation2 + $0x74] sm:$0xf]  ;;  %431 = vst [vmem:[#allocation2 + $0xe8] sm:$0xff] %v399_v29  ;;  %v396_v43 = vpack.c.bf16 %v359_v40, %v1165_v13  ;;  %v397_v44 = vpack.c.bf16 %v361_v41, %v1165_v13  ;;  %v322_v45 = vsel %vm258_vm12, 1.0, %v1165_v13  ;;  %v324_v46 = vsel %vm260_vm13, 1.0, %v1165_v13 }
  0x1e   : > { %v1002_v47 = vld [vmem:[#allocation2 + $0x78] sm:$0xf0]  ;;  %412 = vst [vmem:[#allocation2 + $0x50] sm:$0xff] %v380_v35  ;;  %v378_v48 = vpack.c.bf16 1.0, %v322_v45  ;;  %v379_v49 = vpack.c.bf16 1.0, %v324_v46  ;;  %v232_v50 = vadd.s32 200, %v1204_v1  ;;  %vm291_vm14 = vcmp.le.s32.totalorder %v231_v37, %v1214_v7 }
  0x1f   : > { %v1005_v51 = vor.u32 %v1089_v42, %v1002_v47  ;;  %v1105_v52 = vld [vmem:[#allocation2 + $0xf4] sm:$0xf]  ;;  %413 = vst [vmem:[#allocation2 + $0x58] sm:$0xff] %v381_v39  ;;  %v355_v53 = vsel %vm291_vm14, 1.0, %v1165_v13  ;;  %v213_v54 = vadd.s32 48, %v1204_v1  ;;  %v214_v55 = vadd.s32 56, %v1204_v1 }
  0x20   : > { %v1066_v56 = vld [vmem:[#allocation2 + $0xf8] sm:$0xf0]  ;;  %428 = vst [vmem:[#allocation2 + $0xd0] sm:$0xff] %v396_v43  ;;  %vm293_vm15 = vcmp.le.s32.totalorder %v232_v50, %v1214_v7  ;;  %v394_v57 = vpack.c.bf16 %v355_v53, %v1165_v13  ;;  %v229_v58 = vadd.s32 176, %v1204_v1  ;;  %v230_v59 = vadd.s32 184, %v1204_v1 }
  0x21   : > { %684 = vmatpush.bf16.msra.mxu2 %v1005_v51  ;;  %v1069_v60 = vor.u32 %v1105_v52, %v1066_v56  ;;  %v1087_v61 = vld [vmem:[#allocation2 + $0x64] sm:$0xf]  ;;  %429 = vst [vmem:[#allocation2 + $0xd8] sm:$0xff] %v397_v44  ;;  %v357_v62 = vsel %vm293_vm15, 1.0, %v1165_v13  ;;  %vm254_vm0 = vcmp.le.s32.totalorder %v213_v54, %v1207_v2  ;;  %vm256_vm1 = vcmp.le.s32.totalorder %v214_v55, %v1207_v2 }
  0x22   : > { %v994_v63 = vld [vmem:[#allocation2 + $0x68] sm:$0xf0]  ;;  %410 = vst [vmem:[#allocation2 + $0x40] sm:$0xff] %v378_v48  ;;  %v395_v3 = vpack.c.bf16 %v357_v62, %v1165_v13  ;;  %v318_v4 = vsel %vm254_vm0, 1.0, %v1165_v13  ;;  %v320_v5 = vsel %vm256_vm1, 1.0, %v1165_v13  ;;  %vm287_vm2 = vcmp.le.s32.totalorder %v229_v58, %v1214_v7 }
  0x23   : > { %697 = vmatpush.bf16.msra.mxu3 %v1069_v60  ;;  %v997_v6 = vor.u32 %v1087_v61, %v994_v63  ;;  %v1103_v8 = vld [vmem:[#allocation2 + $0xe4] sm:$0xf]  ;;  %411 = vst [vmem:[#allocation2 + $0x48] sm:$0xff] %v379_v49  ;;  %v376_v9 = vpack.c.bf16 1.0, %v318_v4  ;;  %v377_v10 = vpack.c.bf16 1.0, %v320_v5  ;;  %vm289_vm3 = vcmp.le.s32.totalorder %v230_v59, %v1214_v7 }
  0x24   : > { %v1058_v11 = vld [vmem:[#allocation2 + $0xe8] sm:$0xf0]  ;;  %426 = vst [vmem:[#allocation2 + $0xc0] sm:$0xff] %v394_v57  ;;  %v351_v12 = vsel %vm287_vm2, 1.0, %v1165_v13  ;;  %v353_v14 = vsel %vm289_vm3, 1.0, %v1165_v13  ;;  %v211_v15 = vadd.s32 32, %v1204_v1  ;;  %vm242_vm4 = vcmp.le.s32.totalorder %v1204_v1, %v1207_v2 }
  0x25   : > { %685 = vmatpush.bf16.msra.mxu2 %v997_v6  ;;  %v1061_v16 = vor.u32 %v1103_v8, %v1058_v11  ;;  %v1085_v17 = vld [vmem:[#allocation2 + $0x54] sm:$0xf]  ;;  %427 = vst [vmem:[#allocation2 + $0xc8] sm:$0xff] %v395_v3  ;;  %v392_v18 = vpack.c.bf16 %v351_v12, %v1165_v13  ;;  %v393_v19 = vpack.c.bf16 %v353_v14, %v1165_v13  ;;  %v212_v20 = vadd.s32 40, %v1204_v1 }
  0x26   : > { %v986_v21 = vld [vmem:[#allocation2 + $0x58] sm:$0xf0]  ;;  %408 = vst [vmem:[#allocation2 + $0x30] sm:$0xff] %v376_v9  ;;  %vm250_vm5 = vcmp.le.s32.totalorder %v211_v15, %v1207_v2  ;;  %v227_v22 = vadd.s32 160, %v1204_v1  ;;  %v228_v23 = vadd.s32 168, %v1204_v1  ;;  %v209_v24 = vadd.s32 16, %v1204_v1 }
  0x27   : > { %698 = vmatpush.bf16.msra.mxu3 %v1061_v16  ;;  %v989_v25 = vor.u32 %v1085_v17, %v986_v21  ;;  %v1101_v26 = vld [vmem:[#allocation2 + $0xd4] sm:$0xf]  ;;  %409 = vst [vmem:[#allocation2 + $0x38] sm:$0xff] %v377_v10  ;;  %vm252_vm6 = vcmp.le.s32.totalorder %v212_v20, %v1207_v2  ;;  %v314_v27 = vsel %vm250_vm5, 1.0, %v1165_v13  ;;  %v210_v28 = vadd.s32 24, %v1204_v1 }
  0x28   : > { %v1050_v29 = vld [vmem:[#allocation2 + $0xd8] sm:$0xf0]  ;;  %424 = vst [vmem:[#allocation2 + $0xb0] sm:$0xff] %v392_v18  ;;  %v316_v30 = vsel %vm252_vm6, 1.0, %v1165_v13  ;;  %v374_v31 = vpack.c.bf16 1.0, %v314_v27  ;;  %vm283_vm7 = vcmp.le.s32.totalorder %v227_v22, %v1214_v7  ;;  %vm285_vm8 = vcmp.le.s32.totalorder %v228_v23, %v1214_v7 }
  0x29   : > { %686 = vmatpush.bf16.msra.mxu2 %v989_v25  ;;  %v1053_v32 = vor.u32 %v1101_v26, %v1050_v29  ;;  %v1083_v33 = vld [vmem:[#allocation2 + $0x44] sm:$0xf]  ;;  %425 = vst [vmem:[#allocation2 + $0xb8] sm:$0xff] %v393_v19  ;;  %v375_v34 = vpack.c.bf16 1.0, %v316_v30  ;;  %v347_v35 = vsel %vm283_vm7, 1.0, %v1165_v13  ;;  %v349_v36 = vsel %vm285_vm8, 1.0, %v1165_v13 }
  0x2a   : > { %v978_v37 = vld [vmem:[#allocation2 + $0x48] sm:$0xf0]  ;;  %406 = vst [vmem:[#allocation2 + $0x20] sm:$0xff] %v374_v31  ;;  %v390_v38 = vpack.c.bf16 %v347_v35, %v1165_v13  ;;  %v391_v39 = vpack.c.bf16 %v349_v36, %v1165_v13  ;;  %vm246_vm9 = vcmp.le.s32.totalorder %v209_v24, %v1207_v2  ;;  %vm248_vm10 = vcmp.le.s32.totalorder %v210_v28, %v1207_v2  ;;  %v1339_v19 = vld [vmem:[%s197_s16] sm:$0xff]  ;;  %v1000_v35 = vld [vmem:[#allocation2 + $0x70] sm:$0xf] }
  0x2b   : > { %699 = vmatpush.bf16.msra.mxu3 %v1053_v32  ;;  %v981_v40 = vor.u32 %v1083_v33, %v978_v37  ;;  %v1099_v41 = vld [vmem:[#allocation2 + $0xc4] sm:$0xf]  ;;  %407 = vst [vmem:[#allocation2 + $0x28] sm:$0xff] %v375_v34  ;;  %v310_v42 = vsel %vm246_vm9, 1.0, %v1165_v13  ;;  %v312_v43 = vsel %vm248_vm10, 1.0, %v1165_v13  ;;  %v225_v44 = vadd.s32 144, %v1204_v1 }
  0x2c   : > { %v1042_v45 = vld [vmem:[#allocation2 + $0xc8] sm:$0xf0]  ;;  %422 = vst [vmem:[#allocation2 + $0xa0] sm:$0xff] %v390_v38  ;;  %v372_v46 = vpack.c.bf16 1.0, %v310_v42  ;;  %v373_v47 = vpack.c.bf16 1.0, %v312_v43  ;;  %v226_v48 = vadd.s32 152, %v1204_v1  ;;  %v492_v24 = vunpack.c.l.b16 %v1339_v19 }
  0x2d   : > { %687 = vmatpush.bf16.msra.mxu2 %v981_v40  ;;  %v1045_v49 = vor.u32 %v1099_v41, %v1042_v45  ;;  %v1081_v50 = vld [vmem:[#allocation2 + $0x34] sm:$0xf]  ;;  %423 = vst [vmem:[#allocation2 + $0xa8] sm:$0xff] %v391_v39  ;;  %vm279_vm11 = vcmp.le.s32.totalorder %v225_v44, %v1214_v7  ;;  %v208_v51 = vadd.s32 8, %v1204_v1  ;;  %v306_v52 = vsel %vm242_vm4, 1.0, %v1165_v13 }
  0x2e   : > { %v970_v53 = vld [vmem:[#allocation2 + $0x38] sm:$0xf0]  ;;  %404 = vst [vmem:[#allocation2 + $0x10] sm:$0xff] %v372_v46  ;;  %vm281_vm12 = vcmp.le.s32.totalorder %v226_v48, %v1214_v7  ;;  %v343_v54 = vsel %vm279_vm11, 1.0, %v1165_v13  ;;  %v370_v55 = vpack.c.bf16 1.0, %v306_v52  ;;  %v223_v56 = vadd.s32 128, %v1204_v1 }
  0x2f   : > { %700 = vmatpush.bf16.msra.mxu3 %v1045_v49  ;;  %v973_v57 = vor.u32 %v1081_v50, %v970_v53  ;;  %v1097_v58 = vld [vmem:[#allocation2 + $0xb4] sm:$0xf]  ;;  %405 = vst [vmem:[#allocation2 + $0x18] sm:$0xff] %v373_v47  ;;  %v345_v59 = vsel %vm281_vm12, 1.0, %v1165_v13  ;;  %v388_v60 = vpack.c.bf16 %v343_v54, %v1165_v13  ;;  %vm244_vm13 = vcmp.le.s32.totalorder %v208_v51, %v1207_v2  ;;  %v1090_v36 = vld [vmem:[#allocation2 + $0x74] sm:$0xf0] }
  0x30   : > { %v1034_v61 = vld [vmem:[#allocation2 + $0xb8] sm:$0xf0]  ;;  %v389_v62 = vpack.c.bf16 %v345_v59, %v1165_v13  ;;  %v308_v63 = vsel %vm244_vm13, 1.0, %v1165_v13  ;;  %402 = vst [vmem:[#allocation2] sm:$0xff] %v370_v55  ;;  %v224_v3 = vadd.s32 136, %v1204_v1  ;;  %vm275_vm14 = vcmp.le.s32.totalorder %v223_v56, %v1214_v7 }
  0x31   : > { %688 = vmatpush.bf16.msra.mxu2 %v973_v57  ;;  %v1037_v4 = vor.u32 %v1097_v58, %v1034_v61  ;;  %v1079_v5 = vld [vmem:[#allocation2 + $0x24] sm:$0xf]  ;;  %420 = vst [vmem:[#allocation2 + $0x90] sm:$0xff] %v388_v60  ;;  %v371_v6 = vpack.c.bf16 1.0, %v308_v63  ;;  %v339_v8 = vsel %vm275_vm14, 1.0, %v1165_v13  ;;  %v493_v30 = vunpack.c.h.b16 %v1339_v19 }
  0x32   : > { %v962_v9 = vld [vmem:[#allocation2 + $0x28] sm:$0xf0]  ;;  %421 = vst [vmem:[#allocation2 + $0x98] sm:$0xff] %v389_v62  ;;  %vm277_vm15 = vcmp.le.s32.totalorder %v224_v3, %v1214_v7  ;;  %v386_v10 = vpack.c.bf16 %v339_v8, %v1165_v13  ;;  %v1343_v31 = vpack.c.b16 %v492_v24, %v492_v24  ;;  %v992_v37 = vld [vmem:[#allocation2 + $0x60] sm:$0xf]  ;;  %v1001_v38 = vor.u32 %v1090_v36, %v1000_v35 }
  0x33   : > { %701 = vmatpush.bf16.msra.mxu3 %v1037_v4  ;;  %v965_v11 = vor.u32 %v1079_v5, %v962_v9  ;;  %v1095_v12 = vld [vmem:[#allocation2 + $0xa4] sm:$0xf]  ;;  %403 = vst [vmem:[#allocation2 + $0x8] sm:$0xff] %v371_v6  ;;  %v341_v14 = vsel %vm277_vm15, 1.0, %v1165_v13  ;;  %v1345_v34 = vpack.c.b16 %v493_v30, %v493_v30  ;;  %v1088_v39 = vld [vmem:[#allocation2 + $0x64] sm:$0xf0]  ;;  %vm434_vm0 = vcmp.lt.s32.totalorder %v1207_v2, %v1204_v1 }
  0x34   : > { %v1026_v15 = vld [vmem:[#allocation2 + $0xa8] sm:$0xf0]  ;;  %v387_v16 = vpack.c.bf16 %v341_v14, %v1165_v13  ;;  %418 = vst [vmem:[#allocation2 + $0x80] sm:$0xff] %v386_v10  ;;  %v1064_v40 = vld [vmem:[#allocation2 + $0xf0] sm:$0xf]  ;;  %658 = vmatpush.bf16.msra.mxu0 %v1001_v38  ;;  %v993_v41 = vor.u32 %v1088_v39, %v992_v37  ;;  %v435_v30 = vsel %vm434_vm0, 1.0, %v1165_v13 }
  0x35   : > { %689 = vmatpush.bf16.msra.mxu2 %v965_v11  ;;  %v1029_v17 = vor.u32 %v1095_v12, %v1026_v15  ;;  %v1077_v18 = vld [vmem:[#allocation2 + $0x14] sm:$0xf]  ;;  %v984_v42 = vld [vmem:[#allocation2 + $0x50] sm:$0xf]  ;;  %v1106_v43 = vld [vmem:[#allocation2 + $0xf4] sm:$0xf0] }
  0x36   : > { %v954_v20 = vld [vmem:[#allocation2 + $0x18] sm:$0xf0]  ;;  %419 = vst [vmem:[#allocation2 + $0x88] sm:$0xff] %v387_v16  ;;  %v1086_v44 = vld [vmem:[#allocation2 + $0x54] sm:$0xf0]  ;;  %v1065_v45 = vor.u32 %v1106_v43, %v1064_v40  ;;  %vm436_vm1 = vcmask 64512  }
  0x37   : > { %702 = vmatpush.bf16.msra.mxu3 %v1029_v17  ;;  %v957_v21 = vor.u32 %v1077_v18, %v954_v20  ;;  %v1075_v23 = vld [vmem:[#allocation2 + $0x4] sm:$0xf]  ;;  %v1056_v46 = vld [vmem:[#allocation2 + $0xe0] sm:$0xf]  ;;  %v1104_v47 = vld [vmem:[#allocation2 + $0xe4] sm:$0xf0]  ;;  %v985_v49 = vor.u32 %v1086_v44, %v984_v42 }
  0x38   : > { %v1093_v22 = vld [vmem:[#allocation2 + $0x94] sm:$0xf]  ;;  %671 = vmatpush.bf16.msra.mxu1 %v1065_v45  ;;  %v1057_v48 = vor.u32 %v1104_v47, %v1056_v46  ;;  %659 = vmatpush.bf16.msra.mxu0 %v993_v41  ;;  %v1048_v50 = vld [vmem:[#allocation2 + $0xd0] sm:$0xf]  ;;  %v1102_v51 = vld [vmem:[#allocation2 + $0xd4] sm:$0xf0] }
  0x39   : > { %690 = vmatpush.bf16.msra.mxu2 %v957_v21  ;;  %v1018_v25 = vld [vmem:[#allocation2 + $0x98] sm:$0xf0]  ;;  %v976_v52 = vld [vmem:[#allocation2 + $0x40] sm:$0xf]  ;;  %v1084_v53 = vld [vmem:[#allocation2 + $0x44] sm:$0xf0]  ;;  %v1049_v54 = vor.u32 %v1102_v51, %v1048_v50 }
  0x3a   : > { %v1021_v26 = vor.u32 %v1093_v22, %v1018_v25  ;;  %v946_v27 = vld [vmem:[#allocation2 + $0x8] sm:$0xf0]  ;;  %v977_v55 = vor.u32 %v1084_v53, %v976_v52  ;;  %v1040_v56 = vld [vmem:[#allocation2 + $0xc0] sm:$0xf]  ;;  %v1100_v57 = vld [vmem:[#allocation2 + $0xc4] sm:$0xf0] }
  0x3b   : > { %v949_v28 = vor.u32 %v1075_v23, %v946_v27  ;;  %v1091_v29 = vld [vmem:[#allocation2 + $0x84] sm:$0xf]  ;;  %v968_v58 = vld [vmem:[#allocation2 + $0x30] sm:$0xf]  ;;  %v1082_v59 = vld [vmem:[#allocation2 + $0x34] sm:$0xf0]  ;;  %v1041_v60 = vor.u32 %v1100_v57, %v1040_v56 }
  0x3c   : > { %703 = vmatpush.bf16.msra.mxu3 %v1021_v26  ;;  %672 = vmatpush.bf16.msra.mxu1 %v1057_v48  ;;  %v969_v61 = vor.u32 %v1082_v59, %v968_v58  ;;  %v1032_v62 = vld [vmem:[#allocation2 + $0xb0] sm:$0xf]  ;;  %v1098_v63 = vld [vmem:[#allocation2 + $0xb4] sm:$0xf0]  ;;  %v960_v3 = vld [vmem:[#allocation2 + $0x20] sm:$0xf] }
  0x3d   : > { %691 = vmatpush.bf16.msra.mxu2 %v949_v28  ;;  %v1010_v32 = vld [vmem:[#allocation2 + $0x88] sm:$0xf0]  ;;  %660 = vmatpush.bf16.msra.mxu0 %v985_v49  ;;  %v1080_v4 = vld [vmem:[#allocation2 + $0x24] sm:$0xf0]  ;;  %v1033_v5 = vor.u32 %v1098_v63, %v1032_v62  ;;  %v1024_v8 = vld [vmem:[#allocation2 + $0xa0] sm:$0xf] }
  0x3e   : > { %v1013_v33 = vor.u32 %v1091_v29, %v1010_v32  ;;  %v961_v6 = vor.u32 %v1080_v4, %v960_v3  ;;  %v1096_v9 = vld [vmem:[#allocation2 + $0xa4] sm:$0xf0]  ;;  %v952_v10 = vld [vmem:[#allocation2 + $0x10] sm:$0xf]  ;;  %v1078_v11 = vld [vmem:[#allocation2 + $0x14] sm:$0xf0] }
  0x3f   : > { %v1025_v14 = vor.u32 %v1096_v9, %v1024_v8  ;;  %v953_v15 = vor.u32 %v1078_v11, %v952_v10  ;;  %v1016_v16 = vld [vmem:[#allocation2 + $0x90] sm:$0xf]  ;;  %v1094_v17 = vld [vmem:[#allocation2 + $0x94] sm:$0xf0]  ;;  %v944_v20 = vld [vmem:[#allocation2] sm:$0xf] }
  0x40   : > { %704 = vmatpush.bf16.msra.mxu3 %v1013_v33  ;;  %692 = vmatmul.bf16.vlgmr.msra.gmra.mxu2 %v1343_v31  ;;  %v1076_v21 = vld [vmem:[#allocation2 + $0x4] sm:$0xf0]  ;;  %v1017_v23 = vor.u32 %v1094_v17, %v1016_v16  ;;  %v1008_v25 = vld [vmem:[#allocation2 + $0x80] sm:$0xf]  ;;  %437 = vst.msk [vmem:[#allocation3] sm:$0xff] %vm436_vm1, %v435_v30  ;;  %v1167_v32 = vmov 0  }
  0x41   : > { %673 = vmatpush.bf16.msra.mxu1 %v1049_v54  ;;  %661 = vmatpush.bf16.msra.mxu0 %v977_v55  ;;  %v945_v24 = vor.u32 %v1076_v21, %v944_v20  ;;  %v1092_v26 = vld [vmem:[#allocation2 + $0x84] sm:$0xf0]  ;;  %vm447_vm2 = vcmask 0   ;;  %v438_v41 = vmul.u32 256, %v1204_v1  ;;  %vm1360_vm3 = vcmp.lt.s32.totalorder %v206_v0, 256 }
  0x42   : > { %v1009_v28 = vor.u32 %v1092_v26, %v1008_v25  ;;  %1134 = vset.pattern.permute.xlu0 %v1167_v32  ;;  %1135 = vset.pattern.permute.xlu1 %v1167_v32  ;;  %448 = vst.msk [vmem:[#allocation5] sm:$0x1] %vm447_vm2, %v1165_v13  ;;  %v458_v1 = vunpack.c.h.bf16 %v1339_v19  ;;  %v455_v10 = vld [vmem:[%s188_s21 + $0x8] sm:$0xff]  ;;  %vm810_vm4 = vcmask 1040384   ;;  %vm823_vm5 = vcmask 7175  }
  0x43   : > { %705 = vmatmul.bf16.vlgmr.msra.gmra.mxu3 %v1345_v34  ;;  %v439_v42 = vadd.s32 %v438_v41, %v1207_v2  ;;  %v440_v43 = vadd.s32 %v438_v41, %v1214_v7  ;;  %453 = vst.msk [vmem:[#allocation6] sm:$0x3] %vm1360_vm3, %v1165_v13  ;;  %v457_v2 = vunpack.c.l.bf16 %v1339_v19  ;;  %v791_v20 = vmax.f32 %v455_v10, 0.0 }
  0x44   : > { %v769_v58 = vsub.f32 1.0, %v458_v1 }
  0x45   : > { %674 = vmatpush.bf16.msra.mxu1 %v1041_v60  ;;  %662 = vmatpush.bf16.msra.mxu0 %v969_v61  ;;  %v441_v44 = vadd.s32 1, %v439_v42  ;;  %v442_v45 = vadd.s32 1, %v440_v43  ;;  %v768_v57 = vsub.f32 1.0, %v457_v2 }
  0x47   : > { %v710_v33 = vld [vmem:[#allocation3] sm:$0xff]  ;;  %v443_v51 = vcvt.s32.f32 %v441_v44  ;;  %v444_v52 = vcvt.s32.f32 %v442_v45 }
  0x49   : > { %675 = vmatpush.bf16.msra.mxu1 %v1033_v5  ;;  %663 = vmatpush.bf16.msra.mxu0 %v961_v6  ;;  %v454_v6 = vld [vmem:[%s188_s21] sm:$0xff] }
  0x4a   : > { %v790_v16 = vmax.f32 %v454_v6, 0.0 }
  0x4d   : > { %676 = vmatpush.bf16.msra.mxu1 %v1025_v14  ;;  %664 = vmatpush.bf16.msra.mxu0 %v953_v15 }
  0x51   : > { %677 = vmatpush.bf16.msra.mxu1 %v1017_v23  ;;  %665 = vmatpush.bf16.msra.mxu0 %v945_v24 }
  0x54   : > { %666 = vmatmul.bf16.vlgmr.msra.gmra.mxu0 %v1343_v31 }
  0x55   : > { %678 = vmatpush.bf16.msra.mxu1 %v1009_v28 }
  0x58   : > { %679 = vmatmul.bf16.vlgmr.msra.gmra.mxu1 %v1345_v34  ;;  %v1136_v34 = vld [vmem:[#allocation5] ss:$0 sm:$0xff] }
  0x59   : > { %750 = vperm.xlu1 %1135, %v1136_v34  }
  0xc3   : > { %v693_v12 = vpop.f32.mrf.mxu2 }
  0xc6   : > { %v706_v18 = vpop.f32.mrf.mxu3 }
  0xc7   : > { %v707_v22 = vadd.f32 %v706_v18, %v693_v12 }
  0xc9   : > { %712 = vrot.lane.b32.xlu0 %v707_v22, %s1166_s17 }
  0xcb   : > { %v695_v27 = vpop.f32.mrf.mxu2  ;;  %v751_v47 = vpop.permute.xlu1 %750 }
  0xce   : > { %v708_v29 = vpop.f32.mrf.mxu3 }
  0xd1   : > { %v667_v36 = vpop.f32.mrf.mxu0 }
  0xd5   : > { %v680_v37 = vpop.f32.mrf.mxu1 }
  0xd6   : > { %v681_v31 = vadd.f32 %v680_v37, %v667_v36 }
  0xd9   : > { %v669_v38 = vpop.f32.mrf.mxu0 }
  0xdd   : > { %v682_v39 = vpop.f32.mrf.mxu1 }
  0xde   : > { %v794_v39 = vld [vmem:[#allocation6] sm:$0x3] }
 0x13b   : > { %v713_v35 = vpop.permute.xlu0 %712 }
 0x13c   : > { %734 = vmatpush.msrb.mxu0 %v713_v35 }
 0x13d   : > { %1070 = vmatmul.msk.f32.vlgmr.msrb.gmra.mxu0 %vm436_vm1, %v710_v33 }
 0x1ba   : > { %v736_v40 = vpop.f32.mrf.mxu0 }
 0x1bb   : > { %742 = vperm.xlu0 %1134, %v736_v40  }
 0x22d   : > { %v743_v46 = vpop.permute.xlu0 %742 }
 0x22e   : > { %v745_v49 = vadd.f32 %v743_v46, %v681_v31  ;;  %v746_v50 = vadd.f32 %v743_v46, %v707_v22 }
 0x230   : > { %v753_v7 = vadd.f32 %v751_v47, %v745_v49  ;;  %v754_v53 = vadd.f32 %v751_v47, %v746_v50 }
 0x232   : > { %v762_v54 = vsub.f32 %v443_v51, %v753_v7  ;;  %v763_v0 = vsub.f32 %v444_v52, %v754_v53  ;;  %820 = vrot.lane.b32.xlu2 %v754_v53, %s1166_s17  ;;  %v770_v13 = vsub.f32 256.0, %v753_v7  ;;  %v771_v63 = vsub.f32 256.0, %v754_v53 }
 0x234   : > { %v764_v55 = vadd.f32 256.0, %v762_v54  ;;  %v765_v56 = vadd.f32 256.0, %v763_v0  ;;  %v772_v11 = vmul.f32 %v770_v13, %v768_v57  ;;  %v773_v14 = vmul.f32 %v771_v63, %v769_v58 }
 0x236   : > { %v776_v59 = vsub.f32 %v764_v55, %v768_v57  ;;  %v777_v60 = vsub.f32 %v765_v56, %v769_v58  ;;  %v766_v4 = vmul.f32 %v764_v55, %v457_v2  ;;  %v767_v8 = vmul.f32 %v765_v56, %v458_v1 }
 0x238   : > { %v778_v61 = vmul.f32 %v776_v59, %v764_v55  ;;  %v779_v62 = vmul.f32 %v777_v60, %v765_v56  ;;  %v774_v17 = vadd.f32 %v772_v11, %v766_v4  ;;  %v775_v21 = vadd.f32 %v773_v14, %v767_v8 }
 0x23a   : > { %1137 = vrcp.f32 %v778_v61 }
 0x23b   : > { %1139 = vrcp.f32 %v779_v62 }
 0x240   : > { %v1138_v19 = vpop.eup %1137 }
 0x241   : > { %v1140_v3 = vpop.eup %1139  ;;  %v782_v5 = vmul.f32 %v1138_v19, %v778_v61 }
 0x242   : > { %v783_v9 = vmul.f32 %v1140_v3, %v779_v62 }
 0x243   : > { %v784_v12 = vsub.f32 2.0, %v782_v5 }
 0x244   : > { %v785_v15 = vsub.f32 2.0, %v783_v9 }
 0x245   : > { %v786_v18 = vmul.f32 %v1138_v19, %v784_v12 }
 0x246   : > { %v787_v22 = vmul.f32 %v1140_v3, %v785_v15 }
 0x247   : > { %v788_v23 = vmul.f32 %v786_v18, %v774_v17 }
 0x248   : > { %v789_v24 = vmul.f32 %v787_v22, %v775_v21 }
 0x249   : > { %v792_v25 = vmul.f32 %v790_v16, %v788_v23 }
 0x24a   : > { %v793_v26 = vmul.f32 %v791_v20, %v789_v24 }
 0x24b   : > { %v795_v27 = vrot.slane %v792_v25, 4 }
 0x24c   : > { %v801_v28 = vrot.slane %v793_v26, 4 }
 0x24d   : > { %v796_v29 = vadd.f32 %v795_v27, %v792_v25 }
 0x24e   : > { %v802_v30 = vadd.f32 %v801_v28, %v793_v26 }
 0x24f   : > { %v797_v32 = vrot.slane %v796_v29, 2 }
 0x250   : > { %v803_v33 = vrot.slane %v802_v30, 2 }
 0x251   : > { %v798_v35 = vadd.f32 %v797_v32, %v796_v29 }
 0x252   : > { %v804_v36 = vadd.f32 %v803_v33, %v802_v30 }
 0x253   : > { %v799_v37 = vrot.slane %v798_v35, 1 }
 0x254   : > { %v805_v31 = vrot.slane %v804_v36, 1 }
 0x255   : > { %v800_v34 = vadd.f32 %v799_v37, %v798_v35 }
 0x256   : > { %v806_v38 = vadd.f32 %v805_v31, %v804_v36 }
 0x258   : > { %v809_v40 = vrot.slane %v806_v38, 7 }
 0x25a   : > { %v811_v41 = vsel %vm810_vm4, %v800_v34, %v809_v40 }
 0x25b   : > { %v813_v42 = vadd.f32 %v811_v41, %v794_v39 }
 0x25d   : > { %818 = vst.msk [vmem:[#allocation6] sm:$0x3] %vm1360_vm3, %v813_v42 }
 0x264   : > { %v828_v43 = vld [vmem:[#allocation6] sm:$0x3] }
 0x265   : > { %v830_v44 = vperm.slane %v828_v43, 0  ;;  %v831_v45 = vperm.slane %v828_v43, 1 }
 0x267   : > { %v834_v46 = vsel %vm810_vm4, %v830_v44, 0.0  ;;  %v835_v47 = vsel %vm810_vm4, %v831_v45, 0.0 }
 0x268   : > { %v836_v49 = vadd.f32 %v835_v47, %v834_v46 }
 0x26a   : > { %837 = vadd.xlane.f32.xlu1 %v836_v49 }
 0x28c   : > { %v821_v50 = vpop.permute.xlu2 %820 }
 0x28d   : > { %824 = vst.msk [vmem:[#allocation5 - $0x7] sm:$0x80] %vm823_vm5, %v821_v50 }
 0x2dd   : > { %v838_v51 = vpop.xlane.xlu1 %837 }
 0x2de   : > { %v839_v52 = vperm.slane %v838_v51, 0 }
 0x2e0   : > { %840 = vst [vmem:[%s201_s24] sm:$0xff] %v839_v52 }
 0x2e1 PF: > { %s12_s11 = sadd.s32 1, %s1163_s11   ;;  %s1395_s9 = smov %s1159_s10 }
 0x2e2   : > { %p9_p5 = scmp.ge.s32.totalorder %s12_s11, 4   ;;  %s1396_s10 = smov %s1398_s12 }
 0x2e4   :  { %11 = sbr.rel (!%p9_p5) target bundleno = 2 (0x2), region = 69 }

</bundles_post_ra>
